<compile_context>
chip_gen: v6e
topology: v6e:2x2x1
jax: 0.10.0
libtpu: 0.0.40
codegen_flags: <defaults>
</compile_context>

<pallas_src>
import jax
import jax.numpy as jnp
from jax import lax
from jax.experimental import pallas as pl
from jax.experimental.pallas import tpu as pltpu

LANES = 128          # vreg lane width
ACC_ROWS = 64        # accumulator rows = 8 x (8,128) vregs -> 8 independent add chains
NUM_PARTS = 2        # leading "parallel" grid axis (one partial per TensorCore on v7x)


def _round_up(x, m):
    return -(-x // m) * m


def _partial_sum_kernel(nrows_ref, v_ref, o_ref):
    p = pl.program_id(0)
    i = pl.program_id(1)

    @pl.when(i == 0)
    def _():
        o_ref[...] = jnp.zeros_like(o_ref)

    tile_rows = v_ref.shape[0]
    tile_idx = p * pl.num_programs(1) + i              # UNclamped global tile index
    rows_left = nrows_ref[0] - tile_idx * tile_rows    # valid rows in this tile

    def accumulate(x):
        # (tile_rows, 128) -> (tile_rows//64, 64, 128) -> fold into (64, 128):
        # 8 independent per-vreg accumulation chains keep the VALU slots busy.
        o_ref[...] += x.reshape(-1, ACC_ROWS, LANES).sum(axis=0)

    @pl.when(rows_left >= tile_rows)        # steady state: unmasked VPU adds only
    def _():
        accumulate(v_ref[...].astype(jnp.float32))

    @pl.when(rows_left < tile_rows)         # last (partial / overhanging) tile only
    def _():
        x = v_ref[...].astype(jnp.float32)
        row_id = lax.broadcasted_iota(jnp.int32, x.shape, 0)
        accumulate(jnp.where(row_id < rows_left, x, 0.0))


def linear_regression_sum(v, params, *, max_tile_bytes=8 * 1024 * 1024):
    """Forward pass of LinearRegressionSum.

    v:      any-shape float array (flattened; kept in its native dtype).
    params: f32[5] = [input_sk.weight, input_sk.bias,
                      output_sk[0].weight[0,0], output_sk[0].weight[0,1],
                      output_sk[0].bias]
    Returns f32[1].
    """
    params = params.astype(jnp.float32)
    v = jnp.ravel(v)
    true_n = v.shape[0]

    # Minimal layout padding only. Inputs of >= one minimum tile whose length is
    # already a multiple of 128 reach the kernel with ZERO wrapper copies.
    min_elems = ACC_ROWS * LANES                       # 8192 elems = one minimum tile
    if true_n < min_elems:
        padded_n = min_elems                           # tiny input: <= 32 KiB pad
    else:
        padded_n = _round_up(true_n, LANES)            # lane alignment only
    if padded_n != true_n:
        # TODO(synk): a manual-DMA 1-D path (memory_space=pl.ANY) would avoid this
        # whole-array pad copy for lane-unaligned N; aligned N is copy-free.
        v = jnp.pad(v, (0, padded_n - true_n))
    rows = padded_n // LANES
    v2d = v.reshape(rows, LANES)                       # contiguous reshape: no HBM traffic

    # Balanced tiling: ~max_tile_bytes of input per grid step, tile_rows a multiple
    # of ACC_ROWS and never larger than the array; grid split into NUM_PARTS
    # partitions for the v7x megacore.
    itemsize = jnp.dtype(v2d.dtype).itemsize
    max_tile_rows = max(ACC_ROWS,
                        (max_tile_bytes // (LANES * itemsize)) // ACC_ROWS * ACC_ROWS)
    tile_cap = min(max_tile_rows, (rows // ACC_ROWS) * ACC_ROWS)
    n_data_tiles = pl.cdiv(rows, tile_cap)
    num_parts = NUM_PARTS if n_data_tiles >= NUM_PARTS else 1
    total_tiles = _round_up(n_data_tiles, num_parts)
    tile_rows = _round_up(pl.cdiv(rows, total_tiles), ACC_ROWS)
    tiles_per_part = total_tiles // num_parts
    last_data_tile = pl.cdiv(rows, tile_rows) - 1      # last tile that starts in-bounds

    def v_index_map(p, i):
        # Clamp so a (rare) fully-out-of-bounds trailing tile re-reads the last
        # in-bounds tile; the kernel masks its contribution to zero.
        return (jnp.minimum(p * tiles_per_part + i, last_data_tile), 0)

    tile_bytes = tile_rows * LANES * itemsize
    nrows = jnp.array([rows], dtype=jnp.int32)         # exact row count (int32 in SMEM)

    partials = pl.pallas_call(
        _partial_sum_kernel,
        out_shape=jax.ShapeDtypeStruct((num_parts, ACC_ROWS, LANES), jnp.float32),
        grid=(num_parts, tiles_per_part),
        in_specs=[
            pl.BlockSpec(memory_space=pltpu.MemorySpace.SMEM),
            pl.BlockSpec((tile_rows, LANES), v_index_map),
        ],
        out_specs=pl.BlockSpec((None, ACC_ROWS, LANES), lambda p, i: (p, 0, 0)),
        compiler_params=pltpu.CompilerParams(
            dimension_semantics=("parallel", "arbitrary"),
            vmem_limit_bytes=int(2 * tile_bytes + (16 << 20))),
        cost_estimate=pl.CostEstimate(
            flops=2 * rows * LANES,
            transcendentals=0,
            bytes_accessed=rows * LANES * itemsize
                           + num_parts * ACC_ROWS * LANES * 4 + 8),
    )(nrows, v2d)

    # O(1) epilogue in the wrapper (tiny, and keeps the per-core partials race-free):
    # sum(v) -> w1*sum + b1*N -> cat(count=1) -> Linear(2,1) -> sigmoid.
    w1, b1, w2_0, w2_1, b2 = (params[j] for j in range(5))
    total = jnp.sum(partials)
    mapped_sum = w1 * total + b1 * jnp.float32(true_n)   # == sum_i (w1*v_i + b1)
    count = jnp.float32(1.0)                             # len(mapped_v) == 1 always
    z = w2_0 * mapped_sum + w2_1 * count + b2
    return jax.nn.sigmoid(z).reshape(1)


def reference(v, params):
    params = params.astype(jnp.float32)
    w1, b1, w2_0, w2_1, b2 = (params[j] for j in range(5))
    mapped_sum = w1 * jnp.sum(jnp.ravel(v).astype(jnp.float32)) + b1 * v.size
    z = w2_0 * mapped_sum + w2_1 * 1.0 + b2
    return jax.nn.sigmoid(z).reshape(1)


if __name__ == "__main__":
    key = jax.random.PRNGKey(0)
    # Deterministic params: [input_sk.w, input_sk.b, output_sk.w[0,0], output_sk.w[0,1], output_sk.b]
    params = jnp.array([0.02, -0.001, 0.3, -0.2, 0.05], dtype=jnp.float32)

    # Case 1: small f32 vector -> single minimum-size tile.
    v1 = jax.random.normal(key, (1024,), dtype=jnp.float32)
    out1 = jax.block_until_ready(linear_regression_sum(v1, params))
    ref1 = reference(v1, params)
    assert out1.shape == (1,)
    assert jnp.allclose(out1, ref1, rtol=1e-5, atol=1e-5), (out1, ref1)

    # Case 2: bf16 input kept in native dtype (kernel upcasts per tile), length
    # not a multiple of 128 -> minimal pad + zero-tail handling.
    v2 = jax.random.normal(jax.random.PRNGKey(1), (3000,), dtype=jnp.bfloat16)
    out2 = jax.block_until_ready(linear_regression_sum(v2, params))
    ref2 = reference(v2, params)
    assert jnp.allclose(out2, ref2, rtol=1e-5, atol=1e-5), (out2, ref2)

    # Case 3: multi-tile path: 2-way "parallel" partition, balanced tiles and a
    # masked partial last tile (small per-step tile budget forces it at small N).
    v3 = jax.random.normal(jax.random.PRNGKey(2), (50000,), dtype=jnp.float32)
    out3 = jax.block_until_ready(
        linear_regression_sum(v3, params, max_tile_bytes=64 * 1024))
    ref3 = reference(v3, params)
    assert jnp.allclose(out3, ref3, rtol=1e-5, atol=1e-5), (out3, ref3)

    print("KERNEL_OK")
</pallas_src>

<mosaic_0001>
module attributes {stable_mosaic.version = 11 : i64} {
  func.func @_partial_sum_kernel(%arg0: i32, %arg1: i32, %arg2: memref<1xi32, #tpu.memory_space<smem>>, %arg3: memref<64x128xf32, #tpu.memory_space<vmem>>, %arg4: memref<1x64x128xf32, #tpu.memory_space<vmem>>) attributes {dimension_semantics = [#tpu.dimension_semantics<parallel>, #tpu.dimension_semantics<arbitrary>], iteration_bounds = array<i64: 1, 1>, scalar_prefetch = 0 : i64, scratch_operands = 0 : i64, tpu.core_type = #tpu.core_type<tc>, window_params = [{transform_indices = @transform_0, window_bounds = array<i64: 1>}, {transform_indices = @transform_1, window_bounds = array<i64: 64, 128>}, {transform_indices = @transform_2, window_bounds = array<i64: 1, 64, 128>}]} {
    %c0_i32 = arith.constant 0 : i32
    %0 = arith.cmpi eq, %arg1, %c0_i32 : i32
    %1 = arith.extui %0 : i1 to i32
    %c0_i32_0 = arith.constant 0 : i32
    %2 = arith.cmpi ne, %1, %c0_i32_0 : i32
    scf.if %2 {
      %cst = arith.constant 0.000000e+00 : f32
      %14 = vector.broadcast %cst : f32 to vector<64x128xf32>
      %c0_5 = arith.constant 0 : index
      %c0_6 = arith.constant 0 : index
      %c0_7 = arith.constant 0 : index
      %15 = vector.load %arg4[%c0_5, %c0_6, %c0_7] : memref<1x64x128xf32, #tpu.memory_space<vmem>>, vector<1x64x128xf32>
      %16 = vector.shape_cast %15 : vector<1x64x128xf32> to vector<64x128xf32>
      %17 = vector.shape_cast %14 : vector<64x128xf32> to vector<1x64x128xf32>
      tpu.vector_store %arg4[%c0_5, %c0_6, %c0_7], %17 {strides = array<i32>} : memref<1x64x128xf32, #tpu.memory_space<vmem>>, vector<1x64x128xf32>,
    } else {
    }
    %c1_i32 = arith.constant 1 : i32
    %3 = arith.muli %arg0, %c1_i32 : i32
    %4 = arith.addi %3, %arg1 : i32
    %c0 = arith.constant 0 : index
    %5 = memref.load %arg2[%c0] : memref<1xi32, #tpu.memory_space<smem>>
    %c64_i32 = arith.constant 64 : i32
    %6 = arith.muli %4, %c64_i32 : i32
    %7 = arith.subi %5, %6 : i32
    %c64_i32_1 = arith.constant 64 : i32
    %8 = arith.cmpi sge, %7, %c64_i32_1 : i32
    %9 = arith.extui %8 : i1 to i32
    %c0_i32_2 = arith.constant 0 : i32
    %10 = arith.cmpi ne, %9, %c0_i32_2 : i32
    scf.if %10 {
      %c0_5 = arith.constant 0 : index
      %c0_6 = arith.constant 0 : index
      %14 = vector.load %arg3[%c0_5, %c0_6] : memref<64x128xf32, #tpu.memory_space<vmem>>, vector<64x128xf32>
      %c0_7 = arith.constant 0 : index
      %c0_8 = arith.constant 0 : index
      %c0_9 = arith.constant 0 : index
      %15 = vector.load %arg4[%c0_7, %c0_8, %c0_9] : memref<1x64x128xf32, #tpu.memory_space<vmem>>, vector<1x64x128xf32>
      %16 = vector.shape_cast %15 : vector<1x64x128xf32> to vector<64x128xf32>
      %17 = vector.shape_cast %14 : vector<64x128xf32> to vector<1x64x128xf32>
      %cst = arith.constant dense<0.000000e+00> : vector<64x128xf32>
      %18 = vector.multi_reduction <add>, %17, %cst [0] : vector<1x64x128xf32> to vector<64x128xf32>
      %19 = arith.addf %16, %18 : vector<64x128xf32>
      %c0_10 = arith.constant 0 : index
      %c0_11 = arith.constant 0 : index
      %c0_12 = arith.constant 0 : index
      %20 = vector.load %arg4[%c0_10, %c0_11, %c0_12] : memref<1x64x128xf32, #tpu.memory_space<vmem>>, vector<1x64x128xf32>
      %21 = vector.shape_cast %20 : vector<1x64x128xf32> to vector<64x128xf32>
      %22 = vector.shape_cast %19 : vector<64x128xf32> to vector<1x64x128xf32>
      tpu.vector_store %arg4[%c0_10, %c0_11, %c0_12], %22 {strides = array<i32>} : memref<1x64x128xf32, #tpu.memory_space<vmem>>, vector<1x64x128xf32>,
    } else {
    }
    %c64_i32_3 = arith.constant 64 : i32
    %11 = arith.cmpi slt, %7, %c64_i32_3 : i32
    %12 = arith.extui %11 : i1 to i32
    %c0_i32_4 = arith.constant 0 : i32
    %13 = arith.cmpi ne, %12, %c0_i32_4 : i32
    scf.if %13 {
      %c0_5 = arith.constant 0 : index
      %c0_6 = arith.constant 0 : index
      %14 = vector.load %arg3[%c0_5, %c0_6] : memref<64x128xf32, #tpu.memory_space<vmem>>, vector<64x128xf32>
      %15 = tpu.iota {dimensions = array<i32: 0>} : vector<64x128xi32>
      %16 = vector.broadcast %7 : i32 to vector<64x128xi32>
      %17 = arith.cmpi slt, %15, %16 : vector<64x128xi32>
      %cst = arith.constant 0.000000e+00 : f32
      %18 = vector.broadcast %cst : f32 to vector<64x128xf32>
      %19 = arith.select %17, %14, %18 : vector<64x128xi1>, vector<64x128xf32>
      %c0_7 = arith.constant 0 : index
      %c0_8 = arith.constant 0 : index
      %c0_9 = arith.constant 0 : index
      %20 = vector.load %arg4[%c0_7, %c0_8, %c0_9] : memref<1x64x128xf32, #tpu.memory_space<vmem>>, vector<1x64x128xf32>
      %21 = vector.shape_cast %20 : vector<1x64x128xf32> to vector<64x128xf32>
      %22 = vector.shape_cast %19 : vector<64x128xf32> to vector<1x64x128xf32>
      %cst_10 = arith.constant dense<0.000000e+00> : vector<64x128xf32>
      %23 = vector.multi_reduction <add>, %22, %cst_10 [0] : vector<1x64x128xf32> to vector<64x128xf32>
      %24 = arith.addf %21, %23 : vector<64x128xf32>
      %c0_11 = arith.constant 0 : index
      %c0_12 = arith.constant 0 : index
      %c0_13 = arith.constant 0 : index
      %25 = vector.load %arg4[%c0_11, %c0_12, %c0_13] : memref<1x64x128xf32, #tpu.memory_space<vmem>>, vector<1x64x128xf32>
      %26 = vector.shape_cast %25 : vector<1x64x128xf32> to vector<64x128xf32>
      %27 = vector.shape_cast %24 : vector<64x128xf32> to vector<1x64x128xf32>
      tpu.vector_store %arg4[%c0_11, %c0_12, %c0_13], %27 {strides = array<i32>} : memref<1x64x128xf32, #tpu.memory_space<vmem>>, vector<1x64x128xf32>,
    } else {
    }
    return
  }
  func.func @transform_0(%arg0: i32, %arg1: i32) -> i32 {
    %c0_i32 = arith.constant 0 : i32
    %c0_i32_0 = arith.constant 0 : i32
    return %c0_i32 : i32
  }
  func.func @transform_1(%arg0: i32, %arg1: i32) -> (i32, i32) {
    %c1_i32 = arith.constant 1 : i32
    %0 = arith.muli %arg0, %c1_i32 : i32
    %1 = arith.addi %0, %arg1 : i32
    %c0_i32 = arith.constant 0 : i32
    %2 = arith.minsi %1, %c0_i32 : i32
    %c0_i32_0 = arith.constant 0 : i32
    %c0_i32_1 = arith.constant 0 : i32
    return %2, %c0_i32_0 : i32, i32
  }
  func.func @transform_2(%arg0: i32, %arg1: i32) -> (i32, i32, i32) {
    %c0_i32 = arith.constant 0 : i32
    %c0_i32_0 = arith.constant 0 : i32
    %c0_i32_1 = arith.constant 0 : i32
    return %arg0, %c0_i32, %c0_i32_0 : i32, i32, i32
  }
}

</mosaic_0001>

<bundles_post_ra>
// kernel: tpu_custom_call.1
= control target key start
LH: loop header
LB: loop body
LE: loop exit
PB: predicated region body
PF: predicated region fallthrough
CT: control target
= control target key end

     0   :  { %8 = vsyncpa [#allocation4], 0  ;;  %s278_s0 = inlined_call_operand.<no memory space> [shape: s32[1], index: 0, kind: input, shape index: {}]   ;;  %s279_s1 = inlined_call_operand.hbm [shape: f32[64,128], index: 1, kind: input, shape index: {}]   ;;  %s280_s2 = inlined_call_operand.hbm [shape: f32[1,64,128], index: 2, kind: output, shape index: {}]  }
   0x1   :  { %9 = vsyncpa [#allocation5], 0  ;;  %s237_s9 = smov [#allocation3]  }
   0x2   :  { %s23_s10 = sshll.u32 %s237_s9, 4  ;;  %s24_s10 = int_to_ptr.vmem [resolvable:$true] %s23_s10 }
   0x3   :  { %s201_s11 = scalar_lea.vmem %s24_s10, 1024  ;;  %p206_p1 = scmp.lt.s32.totalorder %s24_s10, %s24_s10 }
   0x4   :  { %p202_p0 = scmp.ne.s32.totalorder %s24_s10, %s201_s11  ;;  %p207_p2 = scmp.lt.s32.totalorder %s201_s11, %s201_s11 }
   0x6   :  { %p208_p3 = por %p207_p2, %p206_p1 }
   0x8   :  { %p209_p4 = pnand %p208_p3, %p202_p0 }
   0xa   :  { %212 = shalt.err (!%p209_p4)
}
   0xb   :  { %s238_s12 = smov 128   ;;  %s239_s13 = smov 8  }
   0xc   :  { %29 = dma.hbm_to_vmem [thread:$0]  %s279_s1, 1024, %s24_s10, [#allocation4], %s238_s12, %s238_s12, %s239_s13  }
   0xd   :  { %233 = dma.done.wait [#allocation4], 1024  }
   0xe   :  { %234 = vsyncadd [#allocation4], 4294966272  ;;  %v240_v0 = vmov 0.0   ;;  %p186_p5 = scmp.lt.s32.totalorder %s278_s0, 64 }
   0xf   :  { %41 = vst [vmem:[#allocation6] sm:$0xff] %v240_v0  ;;  %42 = vst [vmem:[#allocation6 + $0x8] sm:$0xff] %v240_v0 }
  0x10   :  { %43 = vst [vmem:[#allocation6 + $0x10] sm:$0xff] %v240_v0  ;;  %44 = vst [vmem:[#allocation6 + $0x18] sm:$0xff] %v240_v0  ;;  %56 = sbr.rel (%p186_p5) target bundleno = 31 (0x1f), region = 21 }
  0x11   :  { %45 = vst [vmem:[#allocation6 + $0x20] sm:$0xff] %v240_v0  ;;  %46 = vst [vmem:[#allocation6 + $0x28] sm:$0xff] %v240_v0 }
  0x12   :  { %47 = vst [vmem:[#allocation6 + $0x30] sm:$0xff] %v240_v0  ;;  %48 = vst [vmem:[#allocation6 + $0x38] sm:$0xff] %v240_v0 }
  0x15   :  { %v57_v1 = vld [vmem:[#allocation3] sm:$0xff]  ;;  %v58_v3 = vld [vmem:[#allocation3 + $0x8] sm:$0xff]  ;;  %v59_v6 = vld [vmem:[#allocation3 + $0x10] sm:$0xff] }
  0x16   :  { %v65_v2 = vld [vmem:[#allocation6] sm:$0xff]  ;;  %v66_v5 = vld [vmem:[#allocation6 + $0x8] sm:$0xff]  ;;  %v60_v10 = vld [vmem:[#allocation3 + $0x18] sm:$0xff] }
  0x17   :  { %v81_v4 = vadd.f32 %v65_v2, %v57_v1  ;;  %v67_v7 = vld [vmem:[#allocation6 + $0x10] sm:$0xff]  ;;  %v82_v8 = vadd.f32 %v66_v5, %v58_v3  ;;  %v68_v11 = vld [vmem:[#allocation6 + $0x18] sm:$0xff]  ;;  %v61_v12 = vld [vmem:[#allocation3 + $0x20] sm:$0xff] }
  0x18   :  { %v83_v9 = vadd.f32 %v67_v7, %v59_v6  ;;  %v84_v13 = vadd.f32 %v68_v11, %v60_v10  ;;  %v69_v14 = vld [vmem:[#allocation6 + $0x20] sm:$0xff]  ;;  %v62_v15 = vld [vmem:[#allocation3 + $0x28] sm:$0xff]  ;;  %v63_v19 = vld [vmem:[#allocation3 + $0x30] sm:$0xff] }
  0x19   :  { %89 = vst [vmem:[#allocation6] sm:$0xff] %v81_v4  ;;  %v70_v16 = vld [vmem:[#allocation6 + $0x28] sm:$0xff]  ;;  %90 = vst [vmem:[#allocation6 + $0x8] sm:$0xff] %v82_v8  ;;  %v85_v17 = vadd.f32 %v69_v14, %v61_v12  ;;  %v71_v20 = vld [vmem:[#allocation6 + $0x30] sm:$0xff] }
  0x1a   :  { %91 = vst [vmem:[#allocation6 + $0x10] sm:$0xff] %v83_v9  ;;  %v86_v18 = vadd.f32 %v70_v16, %v62_v15  ;;  %v64_v21 = vld [vmem:[#allocation3 + $0x38] sm:$0xff]  ;;  %92 = vst [vmem:[#allocation6 + $0x18] sm:$0xff] %v84_v13  ;;  %v87_v22 = vadd.f32 %v71_v20, %v63_v19 }
  0x1b   :  { %v72_v23 = vld [vmem:[#allocation6 + $0x38] sm:$0xff]  ;;  %93 = vst [vmem:[#allocation6 + $0x20] sm:$0xff] %v85_v17 }
  0x1c   :  { %94 = vst [vmem:[#allocation6 + $0x28] sm:$0xff] %v86_v18  ;;  %v88_v24 = vadd.f32 %v72_v23, %v64_v21  ;;  %95 = vst [vmem:[#allocation6 + $0x30] sm:$0xff] %v87_v22 }
  0x1e   :  { %96 = vst [vmem:[#allocation6 + $0x38] sm:$0xff] %v88_v24 }
  0x1f PF:  { %p187_p6 = scmp.ge.s32.totalorder %s278_s0, 64 }
  0x21   :  { %100 = sbr.rel (%p187_p6) target bundleno = 54 (0x36), region = 25 }
  0x26   :  { %v109_v25 = vlaneseq  ;;  %v118_v26 = vstv %s278_s0  ;;  %v101_v27 = vld [vmem:[#allocation3] sm:$0xff]  ;;  %v102_v30 = vld [vmem:[#allocation3 + $0x8] sm:$0xff]  ;;  %v103_v33 = vld [vmem:[#allocation3 + $0x10] sm:$0xff] }
  0x27   :  { %v135_v29 = vld [vmem:[#allocation6] sm:$0xff]  ;;  %v136_v31 = vld [vmem:[#allocation6 + $0x8] sm:$0xff]  ;;  %v137_v35 = vld [vmem:[#allocation6 + $0x10] sm:$0xff] }
  0x28   :  { %v110_v28 = vshrl.u32 %v109_v25, 7  ;;  %v104_v36 = vld [vmem:[#allocation3 + $0x18] sm:$0xff]  ;;  %v105_v40 = vld [vmem:[#allocation3 + $0x20] sm:$0xff]  ;;  %v106_v49 = vld [vmem:[#allocation3 + $0x28] sm:$0xff] }
  0x29   :  { %v138_v39 = vld [vmem:[#allocation6 + $0x18] sm:$0xff]  ;;  %v139_v45 = vld [vmem:[#allocation6 + $0x20] sm:$0xff]  ;;  %v107_v50 = vld [vmem:[#allocation3 + $0x30] sm:$0xff] }
  0x2a   :  { %vm119_vm0 = vcmp.lt.s32.totalorder %v110_v28, %v118_v26  ;;  %v111_v32 = vadd.s32 8, %v110_v28  ;;  %v112_v34 = vadd.s32 16, %v110_v28  ;;  %v113_v37 = vadd.s32 24, %v110_v28  ;;  %v140_v55 = vld [vmem:[#allocation6 + $0x28] sm:$0xff]  ;;  %v141_v56 = vld [vmem:[#allocation6 + $0x30] sm:$0xff]  ;;  %v108_v58 = vld [vmem:[#allocation3 + $0x38] sm:$0xff] }
  0x2b   :  { %v127_v38 = vsel %vm119_vm0, %v101_v27, 0.0  ;;  %v114_v41 = vadd.s32 32, %v110_v28  ;;  %v115_v42 = vadd.s32 40, %v110_v28  ;;  %v116_v43 = vadd.s32 48, %v110_v28  ;;  %v142_v62 = vld [vmem:[#allocation6 + $0x38] sm:$0xff] }
  0x2c   :  { %v151_v44 = vadd.f32 %v135_v29, %v127_v38  ;;  %vm120_vm1 = vcmp.lt.s32.totalorder %v111_v32, %v118_v26  ;;  %vm121_vm2 = vcmp.lt.s32.totalorder %v112_v34, %v118_v26  ;;  %vm122_vm3 = vcmp.lt.s32.totalorder %v113_v37, %v118_v26 }
  0x2d   :  { %v128_v46 = vsel %vm120_vm1, %v102_v30, 0.0  ;;  %v129_v47 = vsel %vm121_vm2, %v103_v33, 0.0  ;;  %v130_v48 = vsel %vm122_vm3, %v104_v36, 0.0  ;;  %vm123_vm4 = vcmp.lt.s32.totalorder %v114_v41, %v118_v26 }
  0x2e   :  { %159 = vst [vmem:[#allocation6] sm:$0xff] %v151_v44  ;;  %v152_v51 = vadd.f32 %v136_v31, %v128_v46  ;;  %v153_v52 = vadd.f32 %v137_v35, %v129_v47  ;;  %v154_v53 = vadd.f32 %v138_v39, %v130_v48  ;;  %v131_v54 = vsel %vm123_vm4, %v105_v40, 0.0 }
  0x2f   :  { %v155_v57 = vadd.f32 %v139_v45, %v131_v54  ;;  %vm124_vm5 = vcmp.lt.s32.totalorder %v115_v42, %v118_v26  ;;  %vm125_vm6 = vcmp.lt.s32.totalorder %v116_v43, %v118_v26  ;;  %v117_v59 = vadd.s32 56, %v110_v28 }
  0x30   :  { %160 = vst [vmem:[#allocation6 + $0x8] sm:$0xff] %v152_v51  ;;  %161 = vst [vmem:[#allocation6 + $0x10] sm:$0xff] %v153_v52  ;;  %v132_v60 = vsel %vm124_vm5, %v106_v49, 0.0  ;;  %v133_v61 = vsel %vm125_vm6, %v107_v50, 0.0 }
  0x31   :  { %162 = vst [vmem:[#allocation6 + $0x18] sm:$0xff] %v154_v53  ;;  %163 = vst [vmem:[#allocation6 + $0x20] sm:$0xff] %v155_v57  ;;  %v156_v63 = vadd.f32 %v140_v55, %v132_v60  ;;  %v157_v0 = vadd.f32 %v141_v56, %v133_v61  ;;  %vm126_vm7 = vcmp.lt.s32.totalorder %v117_v59, %v118_v26 }
  0x32   :  { %v134_v1 = vsel %vm126_vm7, %v108_v58, 0.0 }
  0x33   :  { %164 = vst [vmem:[#allocation6 + $0x28] sm:$0xff] %v156_v63  ;;  %165 = vst [vmem:[#allocation6 + $0x30] sm:$0xff] %v157_v0  ;;  %v158_v2 = vadd.f32 %v142_v62, %v134_v1 }
  0x35   :  { %166 = vst [vmem:[#allocation6 + $0x38] sm:$0xff] %v158_v2 }
  0x36 PF:  { %s241_s0 = smov [#allocation6]  }
  0x37   :  { %s172_s21 = sshll.u32 %s241_s0, 4  ;;  %s173_s21 = int_to_ptr.vmem [resolvable:$true] %s172_s21 }
  0x38   :  { %s213_s22 = scalar_lea.vmem %s173_s21, 1024  ;;  %p218_p8 = scmp.lt.s32.totalorder %s173_s21, %s173_s21 }
  0x39   :  { %p214_p7 = scmp.ne.s32.totalorder %s173_s21, %s213_s22  ;;  %p219_p9 = scmp.lt.s32.totalorder %s213_s22, %s213_s22 }
  0x3b   :  { %p220_p10 = por %p219_p9, %p218_p8 }
  0x3d   :  { %p221_p11 = pnand %p220_p10, %p214_p7 }
  0x3f   :  { %224 = shalt.err (!%p221_p11)
}
  0x40   :  { %178 = dma.vmem_to_hbm [thread:$0]  %s173_s21, 1024, %s280_s2, [#allocation5], %s238_s12, %s238_s12, %s239_s13  }
  0x41   :  { %235 = dma.done.wait [#allocation5], 1024  }
  0x42   :  { %236 = vsyncadd [#allocation5], 4294966272 }
  0x43   :  { %182 = vsyncpa [#allocation4], 1 }
  0x44   :  { %183 = vsyncpa [#allocation5], 1 }

</bundles_post_ra>
